<compile_context>
chip_gen: v5e
topology: v5e:2x2
jax: 0.10.0
libtpu: 0.0.40
codegen_flags: <defaults>
</compile_context>

<pallas_src>
import functools

import jax
import jax.numpy as jnp
from jax.experimental import pallas as pl
from jax.experimental.pallas import tpu as pltpu


def _round_up(x, m):
    return ((x + m - 1) // m) * m


def _ltam_read_kernel(hid_ref, pout_ref, keyt_ref, val_ref, bias_ref, out_ref,
                      *, lambdah):
    # One grid step == one tile of (B*T) rows.
    q = hid_ref[...].astype(jnp.bfloat16)               # (rt, H)  cast in VMEM
    kt = keyt_ref[...]                                   # (H, Mp)  bf16, pre-scaled 1/w^2
    v = val_ref[...]                                     # (Mp, C)  bf16

    # logits = q.k / w^2 - ||k||^2 / (2w^2); the per-row ||q||^2 term is a
    # softmax shift and is dropped.  bias carries +inf on padded slots so their
    # weight is exactly zero.
    logits = jnp.dot(q, kt, preferred_element_type=jnp.float32) - bias_ref[...]
    m = jnp.max(logits, axis=-1, keepdims=True)
    p = jnp.exp(logits - m)                              # (rt, Mp) unnormalized
    denom = jnp.sum(p, axis=-1, keepdims=True)           # (rt, 1), >= 1

    # Deferred normalization: scale the (rt, C) read instead of the (rt, Mp)
    # weights (Mp >> C at production mem_size).
    read = jnp.dot(p.astype(v.dtype), v, preferred_element_type=jnp.float32)
    read = read * pl.reciprocal(denom, approx=True)      # (rt, C)

    # sigmoid + merge in f32 (v5e has no bf16 VPU/EUP).
    pred = 1.0 / (1.0 + jnp.exp(-pout_ref[...].astype(jnp.float32)))
    merged = lambdah * read + (1.0 - lambdah) * pred
    out_ref[...] = jnp.clip(merged, 0.0, 1.0).astype(out_ref.dtype)


def ltam_read_forward(hidden_bth, plain_out_btc, mem_keys, mem_values,
                      *, lambdah, gaussian_width, row_tile=512,
                      mem_table_buffers=2):
    """hidden_bth: (B,T,H); plain_out_btc: (B,T,C) pre-sigmoid logits (f32 or
    bf16); mem_keys: (M,H); mem_values: (M,C)  ->  (B,T,C) f32 in [0,1].

    Set mem_table_buffers=1 (pl.Buffered) on v7x / large mem tables to drop the
    second pipeline buffer of the constant-index memory blocks."""
    B, T, H = hidden_bth.shape
    C = plain_out_btc.shape[-1]
    M = mem_keys.shape[0]
    N = B * T

    # Only the memory-slot axis is padded (to a lane multiple).  H and C stay
    # unpadded: their blocks use the full array dim, so there are no wrapper
    # pad/cast passes over the streamed arrays.
    Mp = _round_up(M, 128)

    # Row tile: multiple of 16 (bf16 sublane packing); ensure >= 2 grid steps
    # when there is enough work so both v7x TensorCores get a share of the
    # "parallel" row axis.
    rt = max(16, (int(row_tile) // 16) * 16)
    rt = min(rt, _round_up(N, 16))
    if pl.cdiv(N, rt) < 2 and N > 16:
        rt = _round_up(pl.cdiv(N, 2), 16)
    grid_rows = pl.cdiv(N, rt)

    # (B,T,*) -> (B*T,*): metadata-only reshapes, streamed in the caller dtype.
    hid = hidden_bth.reshape(N, H)
    pout = plain_out_btc.reshape(N, C)

    # Memory table: tiny, reused (M,*) arrays, prepared once.  1/width^2 is
    # folded into the keys before the bf16 round (pure scale, precision kept).
    w2 = float(gaussian_width) ** 2
    keys_scaled = mem_keys.astype(jnp.float32) * (1.0 / w2)        # (M, H) f32
    keys_bf = keys_scaled.astype(jnp.bfloat16)                     # MXU operand
    keys_t = jnp.pad(keys_bf, ((0, Mp - M), (0, 0))).T             # (H, Mp) bf16
    vals = jnp.pad(mem_values.astype(jnp.bfloat16), ((0, Mp - M), (0, 0)))  # (Mp, C)

    # bias = ||k||^2 / (2 w^2), computed from the same bf16-rounded operand the
    # MXU sees; +inf sentinel on padded slots -> softmax weight exactly 0.
    ksq = 0.5 * w2 * jnp.sum(keys_bf.astype(jnp.float32) ** 2, axis=-1)  # (M,)
    bias = jnp.full((Mp,), jnp.inf, jnp.float32).at[:M].set(ksq).reshape(1, Mp)

    def _table_spec(shape):
        # Block index never changes -> DMA'd only once by the pipeline.
        if mem_table_buffers == 2:
            return pl.BlockSpec(shape, lambda i: (0, 0))
        return pl.BlockSpec(shape, lambda i: (0, 0),
                            pipeline_mode=pl.Buffered(mem_table_buffers))

    kernel = functools.partial(_ltam_read_kernel, lambdah=float(lambdah))

    rows = grid_rows * rt
    flops = 2 * rows * Mp * (H + C) + 4 * rows * Mp + 8 * rows * C
    transcendentals = rows * Mp + rows * C + rows
    bytes_accessed = int(N * H * hid.dtype.itemsize          # hidden in
                         + N * C * pout.dtype.itemsize       # plain_out in
                         + H * Mp * 2 + Mp * C * 2 + Mp * 4  # memory table + bias
                         + N * C * 4)                        # output

    out2d = pl.pallas_call(
        kernel,
        out_shape=jax.ShapeDtypeStruct((N, C), jnp.float32),
        grid_spec=pltpu.PrefetchScalarGridSpec(
            num_scalar_prefetch=0,
            grid=(grid_rows,),
            in_specs=[
                pl.BlockSpec((rt, H), lambda i: (i, 0)),   # hidden row tile
                pl.BlockSpec((rt, C), lambda i: (i, 0)),   # plain_out row tile
                _table_spec((H, Mp)),                      # mem keys^T / w^2 (constant)
                _table_spec((Mp, C)),                      # mem values (constant)
                _table_spec((1, Mp)),                      # ||k||^2/(2w^2) (+inf pad)
            ],
            out_specs=pl.BlockSpec((rt, C), lambda i: (i, 0)),
        ),
        compiler_params=pltpu.CompilerParams(
            dimension_semantics=("parallel",),
            vmem_limit_bytes=32 * 1024 * 1024),
        cost_estimate=pl.CostEstimate(
            flops=flops,
            transcendentals=transcendentals,
            bytes_accessed=bytes_accessed),
    )(hid, pout, keys_t, vals, bias)

    return out2d.reshape(B, T, C)


def _reference(hidden_bth, plain_out_btc, mem_keys, mem_values,
               *, lambdah, gaussian_width):
    """Pure-JAX reference of the same math (for correctness checking)."""
    q = hidden_bth[..., None, :]                                   # (B,T,1,H)
    k = mem_keys[None, None]                                       # (1,1,M,H)
    d2 = jnp.sum((q - k) ** 2, axis=-1)                            # (B,T,M)
    w = jax.nn.softmax(-d2 / (2.0 * gaussian_width ** 2), axis=-1)
    read = jnp.einsum('btm,mc->btc', w, mem_values)
    pred = jax.nn.sigmoid(plain_out_btc)
    return jnp.clip(lambdah * read + (1.0 - lambdah) * pred, 0.0, 1.0)


if __name__ == "__main__":
    # Small shapes consistent with the module's args.
    B, T = 4, 8                   # batch, effective_seq_len
    EVENT, HID, TGT = 16, 32, 16  # event_size, hidden_dim, target_size
    M = 64                        # mem_size
    LAMBDAH = 0.3                 # args.ncache_lambdah
    WIDTH = 1.0                   # args.gaussian_width

    key = jax.random.PRNGKey(0)
    k_inp, k_wh, k_wo, k_mk, k_mv = jax.random.split(key, 5)

    # Inputs to LTAM.forward.
    inp_seq = (jax.random.uniform(k_inp, (B, T, EVENT)) > 0.7).astype(jnp.float32)

    # Simulated popl_model outputs (external module; plain-JAX glue).
    w_h = jax.random.normal(k_wh, (EVENT, HID), jnp.float32) * 0.2
    w_o = jax.random.normal(k_wo, (HID, TGT), jnp.float32) * 0.2
    hidden = jnp.tanh(inp_seq @ w_h)                    # (B, T, HID)  "return_hidden_seq"
    plain_out = (hidden @ w_o).astype(jnp.bfloat16)     # (B, T, TGT)  bf16 logit stream

    # Deterministic synthetic memory (MemNetE2E slots: keys/values).
    mem_keys = jax.random.normal(k_mk, (M, HID), jnp.float32)
    mem_values = jax.random.uniform(k_mv, (M, TGT), jnp.float32)

    pred_out_seq = ltam_read_forward(hidden, plain_out, mem_keys, mem_values,
                                     lambdah=LAMBDAH, gaussian_width=WIDTH)
    pred_out_seq = jax.block_until_ready(pred_out_seq)

    # Reference on the same bf16-rounded operands the kernel consumes
    # (isolates the bf16 quantization that is part of the kernel design).
    hid_r = hidden.astype(jnp.bfloat16).astype(jnp.float32)
    mk_r = mem_keys.astype(jnp.bfloat16).astype(jnp.float32)
    mv_r = mem_values.astype(jnp.bfloat16).astype(jnp.float32)
    po_r = plain_out.astype(jnp.float32)
    ref = _reference(hid_r, po_r, mk_r, mv_r,
                     lambdah=LAMBDAH, gaussian_width=WIDTH)

    assert pred_out_seq.shape == (B, T, TGT)
    assert bool(jnp.all(jnp.isfinite(pred_out_seq)))
    assert jnp.allclose(pred_out_seq, ref, atol=5e-3, rtol=5e-3), "mismatch vs reference"

    print("KERNEL_OK")
</pallas_src>

<mosaic_0001>
module attributes {stable_mosaic.version = 11 : i64} {
  func.func @_ltam_read_kernel(%arg0: i32, %arg1: memref<16x32xf32, #tpu.memory_space<vmem>>, %arg2: memref<16x16xbf16, #tpu.memory_space<vmem>>, %arg3: memref<32x128xbf16, #tpu.memory_space<vmem>>, %arg4: memref<128x16xbf16, #tpu.memory_space<vmem>>, %arg5: memref<1x128xf32, #tpu.memory_space<vmem>>, %arg6: memref<16x16xf32, #tpu.memory_space<vmem>>) attributes {dimension_semantics = [#tpu.dimension_semantics<parallel>], iteration_bounds = array<i64: 2>, scalar_prefetch = 0 : i64, scratch_operands = 0 : i64, tpu.core_type = #tpu.core_type<tc>, window_params = [{transform_indices = @transform_0, window_bounds = array<i64: 16, 32>}, {transform_indices = @transform_1, window_bounds = array<i64: 16, 16>}, {pipeline_mode = #tpu.pipeline_mode<synchronous>, transform_indices = @transform_2, window_bounds = array<i64: 32, 128>}, {pipeline_mode = #tpu.pipeline_mode<synchronous>, transform_indices = @transform_3, window_bounds = array<i64: 128, 16>}, {pipeline_mode = #tpu.pipeline_mode<synchronous>, transform_indices = @transform_4, window_bounds = array<i64: 1, 128>}, {transform_indices = @transform_5, window_bounds = array<i64: 16, 16>}]} {
    %c0 = arith.constant 0 : index
    %c0_0 = arith.constant 0 : index
    %0 = vector.load %arg1[%c0, %c0_0] : memref<16x32xf32, #tpu.memory_space<vmem>>, vector<16x32xf32>
    %1 = arith.truncf %0 : vector<16x32xf32> to vector<16x32xbf16>
    %c0_1 = arith.constant 0 : index
    %c0_2 = arith.constant 0 : index
    %2 = vector.load %arg3[%c0_1, %c0_2] : memref<32x128xbf16, #tpu.memory_space<vmem>>, vector<32x128xbf16>
    %c0_3 = arith.constant 0 : index
    %c0_4 = arith.constant 0 : index
    %3 = vector.load %arg4[%c0_3, %c0_4] : memref<128x16xbf16, #tpu.memory_space<vmem>>, vector<128x16xbf16>
    %cst = arith.constant dense<0.000000e+00> : vector<16x128xf32>
    %4 = tpu.matmul %1, %2, %cst {dimension_numbers = #tpu.dot_dimension_numbers<[1], [0], [0], [1], [0, 0, 1, 1], [], []>} : vector<16x32xbf16>, vector<32x128xbf16>, vector<16x128xf32> -> vector<16x128xf32>
    %c0_5 = arith.constant 0 : index
    %c0_6 = arith.constant 0 : index
    %5 = vector.load %arg5[%c0_5, %c0_6] : memref<1x128xf32, #tpu.memory_space<vmem>>, vector<1x128xf32>
    %6 = vector.broadcast %5 : vector<1x128xf32> to vector<16x128xf32>
    %7 = arith.subf %4, %6 : vector<16x128xf32>
    %cst_7 = arith.constant dense<0xFF800000> : vector<16xf32>
    %8 = vector.multi_reduction <maximumf>, %7, %cst_7 [1] : vector<16x128xf32> to vector<16xf32>
    %9 = vector.shape_cast %8 : vector<16xf32> to vector<16x1xf32>
    %10 = vector.broadcast %9 : vector<16x1xf32> to vector<16x128xf32>
    %11 = arith.subf %7, %10 : vector<16x128xf32>
    %12 = math.exp %11 : vector<16x128xf32>
    %cst_8 = arith.constant dense<0.000000e+00> : vector<16xf32>
    %13 = vector.multi_reduction <add>, %12, %cst_8 [1] : vector<16x128xf32> to vector<16xf32>
    %14 = vector.shape_cast %13 : vector<16xf32> to vector<16x1xf32>
    %15 = arith.truncf %12 : vector<16x128xf32> to vector<16x128xbf16>
    %cst_9 = arith.constant dense<0.000000e+00> : vector<16x16xf32>
    %16 = tpu.matmul %15, %3, %cst_9 {dimension_numbers = #tpu.dot_dimension_numbers<[1], [0], [0], [1], [0, 0, 1, 1], [], []>} : vector<16x128xbf16>, vector<128x16xbf16>, vector<16x16xf32> -> vector<16x16xf32>
    %17 = tpu.reciprocal %14 {approx = true} : vector<16x1xf32> -> vector<16x1xf32>
    %18 = vector.broadcast %17 : vector<16x1xf32> to vector<16x16xf32>
    %19 = arith.mulf %16, %18 : vector<16x16xf32>
    %c0_10 = arith.constant 0 : index
    %c0_11 = arith.constant 0 : index
    %20 = vector.load %arg2[%c0_10, %c0_11] : memref<16x16xbf16, #tpu.memory_space<vmem>>, vector<16x16xbf16>
    %21 = arith.extf %20 : vector<16x16xbf16> to vector<16x16xf32>
    %cst_12 = arith.constant 0.000000e+00 : f32
    %22 = vector.broadcast %cst_12 : f32 to vector<16x16xf32>
    %23 = arith.subf %22, %21 : vector<16x16xf32>
    %24 = math.exp %23 : vector<16x16xf32>
    %cst_13 = arith.constant 1.000000e+00 : f32
    %25 = vector.broadcast %cst_13 : f32 to vector<16x16xf32>
    %26 = arith.addf %25, %24 : vector<16x16xf32>
    %cst_14 = arith.constant 1.000000e+00 : f32
    %27 = vector.broadcast %cst_14 : f32 to vector<16x16xf32>
    %28 = arith.divf %27, %26 : vector<16x16xf32>
    %cst_15 = arith.constant 3.000000e-01 : f32
    %29 = vector.broadcast %cst_15 : f32 to vector<16x16xf32>
    %30 = arith.mulf %29, %19 : vector<16x16xf32>
    %cst_16 = arith.constant 0.699999988 : f32
    %31 = vector.broadcast %cst_16 : f32 to vector<16x16xf32>
    %32 = arith.mulf %31, %28 : vector<16x16xf32>
    %33 = arith.addf %30, %32 : vector<16x16xf32>
    %cst_17 = arith.constant 0.000000e+00 : f32
    %cst_18 = arith.constant 1.000000e+00 : f32
    %34 = vector.broadcast %cst_17 : f32 to vector<16x16xf32>
    %35 = arith.maximumf %34, %33 : vector<16x16xf32>
    %36 = vector.broadcast %cst_18 : f32 to vector<16x16xf32>
    %37 = arith.minimumf %36, %35 : vector<16x16xf32>
    %c0_19 = arith.constant 0 : index
    %c0_20 = arith.constant 0 : index
    %38 = vector.load %arg6[%c0_19, %c0_20] : memref<16x16xf32, #tpu.memory_space<vmem>>, vector<16x16xf32>
    tpu.vector_store %arg6[%c0_19, %c0_20], %37 {strides = array<i32>} : memref<16x16xf32, #tpu.memory_space<vmem>>, vector<16x16xf32>,
    return
  }
  func.func @transform_0(%arg0: i32) -> (i32, i32) {
    %c0_i32 = arith.constant 0 : i32
    %c0_i32_0 = arith.constant 0 : i32
    return %arg0, %c0_i32 : i32, i32
  }
  func.func @transform_1(%arg0: i32) -> (i32, i32) {
    %c0_i32 = arith.constant 0 : i32
    %c0_i32_0 = arith.constant 0 : i32
    return %arg0, %c0_i32 : i32, i32
  }
  func.func @transform_2(%arg0: i32) -> (i32, i32) {
    %c0_i32 = arith.constant 0 : i32
    %c0_i32_0 = arith.constant 0 : i32
    %c0_i32_1 = arith.constant 0 : i32
    return %c0_i32, %c0_i32_0 : i32, i32
  }
  func.func @transform_3(%arg0: i32) -> (i32, i32) {
    %c0_i32 = arith.constant 0 : i32
    %c0_i32_0 = arith.constant 0 : i32
    %c0_i32_1 = arith.constant 0 : i32
    return %c0_i32, %c0_i32_0 : i32, i32
  }
  func.func @transform_4(%arg0: i32) -> (i32, i32) {
    %c0_i32 = arith.constant 0 : i32
    %c0_i32_0 = arith.constant 0 : i32
    %c0_i32_1 = arith.constant 0 : i32
    return %c0_i32, %c0_i32_0 : i32, i32
  }
  func.func @transform_5(%arg0: i32) -> (i32, i32) {
    %c0_i32 = arith.constant 0 : i32
    %c0_i32_0 = arith.constant 0 : i32
    return %arg0, %c0_i32 : i32, i32
  }
}

</mosaic_0001>

<bundles_post_ra>
// kernel: tpu_custom_call.1
= control target key start
LH: loop header
LB: loop body
LE: loop exit
PB: predicated region body
PF: predicated region fallthrough
CT: control target
= control target key end

     0   :  { %s645_s18 = smov 0   ;;  %s706_s0 = inlined_call_operand.vmem [shape: f32[32,32], index: 0, kind: input, shape index: {}]   ;;  %s707_s1 = inlined_call_operand.vmem [shape: bf16[32,16], index: 1, kind: input, shape index: {}]   ;;  %s708_s2 = inlined_call_operand.vmem [shape: bf16[32,128], index: 2, kind: input, shape index: {}]   ;;  %s709_s3 = inlined_call_operand.vmem [shape: bf16[128,16], index: 3, kind: input, shape index: {}]   ;;  %s710_s4 = inlined_call_operand.vmem [shape: f32[1,128], index: 4, kind: input, shape index: {}]   ;;  %s711_s5 = inlined_call_operand.vmem [shape: f32[32,16], index: 5, kind: output, shape index: {}]  }
   0x1 LB: > { %s514_s19 = sadd.s32 4294967295, %s613_s18   ;;  %p518_p0 = scmp.ge.s32.totalorder %s613_s18, 1  ;;  %s613_s18 = sphi %s645_s18, %s15_s18  }
   0x2   : > { %p199_p1 = scmp.lt.s32.totalorder %s613_s18, 3 }
   0x4   : > { %p200_p2 = pnand %p518_p0, %p199_p1 }
   0x5   : > { %s519_s22 = sshll.u32 (!%p200_p2), %s514_s19, 1 }
   0x6   : > { %203 = sbr.rel (%p200_p2) target bundleno = 429 (0x1ad), region = 40  ;;  %p233_p3 = scmp.lt.s32.totalorder (!%p200_p2), %s519_s22, 3 }
   0xb   : > { %v569_v0 = vld [vmem:[%s708_s2 + $0x8] sm:$0xff]  ;;  %v568_v1 = vld [vmem:[%s708_s2] sm:$0xff]  ;;  %s713_s22 = smov (!%p233_p3, %s519_s22), 3  ;;  %vm286_vm0 = vcmask 261120   ;;  %v577_v5 = vld [vmem:[%s709_s3 + $0x38] sm:$0xff]  ;;  %vm443_vm9 = vcmask 130048  }
   0xc   : > { %296 = vmatpush.bf16.msra.mxu0 %v569_v0  ;;  %s520_s25 = sshll.u32 %s713_s22, 3  ;;  %373 = vmatpush.bf16.msra.mxu1 %v577_v5  ;;  %v576_v6 = vld [vmem:[%s709_s3 + $0x30] sm:$0xff]  ;;  %v575_v7 = vld [vmem:[%s709_s3 + $0x28] sm:$0xff]  ;;  %v590_v8 = vld [vmem:[%s710_s4] ss:$0 sm:$0xff]  ;;  %s522_s24 = sshll.u32 %s713_s22, 2 }
   0xd   : > { %s236_s28 = scalar_lea.vmem %s706_s0, %s520_s25  ;;  %v574_v13 = vld [vmem:[%s709_s3 + $0x20] sm:$0xff]  ;;  %v573_v14 = vld [vmem:[%s709_s3 + $0x18] sm:$0xff]  ;;  %v572_v15 = vld [vmem:[%s709_s3 + $0x10] sm:$0xff]  ;;  %s248_s6 = scalar_lea.vmem %s711_s5, %s520_s25 }
   0xe   : > { %v251_v2 = vld [vmem:[%s236_s28] sm:$0xff]  ;;  %v252_v3 = vld [vmem:[%s236_s28 + $0x8] sm:$0xff]  ;;  %s242_s28 = scalar_lea.vmem %s707_s1, %s522_s24 }
   0xf   : > { %v253_v4 = vpack.c.bf16 %v252_v3, %v251_v2  ;;  %v571_v16 = vld [vmem:[%s709_s3 + $0x8] sm:$0xff]  ;;  %v570_v17 = vld [vmem:[%s709_s3] sm:$0xff] }
  0x10   : > { %297 = vmatpush.bf16.msra.mxu0 %v568_v1  ;;  %374 = vmatpush.bf16.msra.mxu1 %v576_v6  ;;  %v579_v27 = vld [vmem:[%s242_s28] sm:$0xff]  }
  0x11   : > { %v580_v28 = vunpack.c.l.bf16 %v579_v27  ;;  %v581_v30 = vunpack.c.h.bf16 %v579_v27 }
  0x13   : > { %533 = vmatmul.msk.bf16.vlgmr.msra.gmra.mxu0 %vm286_vm0, %v253_v4  ;;  %v395_v29 = vsub.f32 0.0, %v580_v28  ;;  %v396_v32 = vsub.f32 0.0, %v581_v30 }
  0x14   : > { %375 = vmatpush.bf16.msra.mxu1 %v575_v7 }
  0x15   : > { %v397_v31 = vmul.f32 1.442695, %v395_v29  ;;  %v399_v33 = vmul.f32 1.442695, %v396_v32 }
  0x18   : > { %376 = vmatpush.bf16.msra.mxu1 %v574_v13 }
  0x1c   : > { %377 = vmatpush.bf16.msra.mxu1 %v573_v14 }
  0x20   : > { %378 = vmatpush.bf16.msra.mxu1 %v572_v15 }
  0x24   : > { %379 = vmatpush.bf16.msra.mxu1 %v571_v16 }
  0x28   : > { %380 = vmatpush.bf16.msra.mxu1 %v570_v17 }
  0x90   : > { %v299_v9 = vpop.f32.mrf.mxu0 }
  0x91   : > { %v308_v10 = vsub.f32 %v299_v9, %v590_v8 }
  0x93   : > { %310 = vmax.xlane.f32.xlu0 %v308_v10 }
  0x98   : > { %v301_v11 = vpop.f32.mrf.mxu0 }
  0x99   : > { %v309_v12 = vsub.f32 %v301_v11, %v590_v8 }
  0x9b   : > { %312 = vmax.xlane.f32.xlu0 %v309_v12 }
 0x106   : > { %v311_v18 = vpop.xlane.xlu0 %310 }
 0x107   : > { %v314_v19 = vsub.f32 %v308_v10, %v311_v18 }
 0x109   : > { %v316_v20 = vmul.f32 1.442695, %v314_v19 }
 0x10b   : > { %591 = vpow2.f32 %v316_v20 }
 0x10e   : > { %v313_v21 = vpop.xlane.xlu0 %312 }
 0x10f   : > { %v315_v22 = vsub.f32 %v309_v12, %v313_v21 }
 0x111   : > { %v592_v23 = vpop.eup %591  ;;  %v318_v24 = vmul.f32 1.442695, %v315_v22 }
 0x112   : > { %320 = vadd.xlane.f32.xlu1 %v592_v23 }
 0x113   : > { %593 = vpow2.f32 %v318_v24 }
 0x114   : > { %595 = vpow2.f32 %v397_v31 }
 0x115   : > { %597 = vpow2.f32 %v399_v33 }
 0x119   : > { %v594_v25 = vpop.eup %593 }
 0x11a   : > { %322 = vadd.xlane.f32.xlu1 %v594_v25  ;;  %v324_v26 = vpack.c.bf16 %v594_v25, %v592_v23  ;;  %v596_v34 = vpop.eup %595 }
 0x11b   : > { %v401_v35 = vadd.f32 1.0, %v596_v34  ;;  %v598_v36 = vpop.eup %597 }
 0x11c   : > { %381 = vmatmul.bf16.vlgmr.msra.gmra.mxu1 %v324_v26  ;;  %v402_v37 = vadd.f32 1.0, %v598_v36 }
 0x11d   : > { %599 = vrcp.f32 %v401_v35  ;;  %vm408_vm1 = vweird.f32 %v401_v35  ;;  %v414_v45 = vand.u32 2147483648, %v401_v35  ;;  %v412_v47 = vand.u32 2147483647, %v401_v35 }
 0x11e   : > { %601 = vrcp.f32 %v402_v37  ;;  %vm423_vm5 = vweird.f32 %v402_v37  ;;  %v429_v53 = vand.u32 2147483648, %v402_v37  ;;  %v427_v56 = vand.u32 2147483647, %v402_v37 }
 0x11f   : > { %v415_v49 = vor.u32 1.1754944e-38, %v414_v45  ;;  %vm413_vm4 = vcmp.eq.f32.partialorder %v412_v47, 8.507059e+37 }
 0x120   : > { %v430_v61 = vor.u32 1.1754944e-38, %v429_v53  ;;  %vm428_vm8 = vcmp.eq.f32.partialorder %v427_v56, 8.507059e+37 }
 0x123   : > { %v600_v38 = vpop.eup %599 }
 0x124   : > { %v404_v39 = vmul.f32 %v600_v38, %v401_v35  ;;  %v602_v41 = vpop.eup %601  ;;  %vm409_vm2 = vweird.f32 %v600_v38 }
 0x125   : > { %v419_v43 = vmul.f32 %v602_v41, %v402_v37  ;;  %vm410_vm3 = vmor %vm408_vm1, %vm409_vm2  ;;  %vm424_vm6 = vweird.f32 %v602_v41 }
 0x126   : > { %v405_v40 = vsub.f32 1.0, %v404_v39  ;;  %vm425_vm7 = vmor %vm423_vm5, %vm424_vm6 }
 0x127   : > { %v420_v48 = vsub.f32 1.0, %v419_v43 }
 0x128   : > { %v406_v42 = vmul.f32 %v600_v38, %v405_v40 }
 0x129   : > { %v421_v51 = vmul.f32 %v602_v41, %v420_v48 }
 0x12a   : > { %v407_v46 = vadd.f32 %v600_v38, %v406_v42 }
 0x12b   : > { %v422_v55 = vadd.f32 %v602_v41, %v421_v51 }
 0x12c   : > { %v411_v50 = vsel %vm410_vm3, %v600_v38, %v407_v46 }
 0x12d   : > { %v416_v52 = vsel %vm413_vm4, %v415_v49, %v411_v50  ;;  %v426_v63 = vsel %vm425_vm7, %v602_v41, %v422_v55 }
 0x12e   : > { %v435_v60 = vmul.f32 0.7, %v416_v52  ;;  %v431_v1 = vsel %vm428_vm8, %v430_v61, %v426_v63 }
 0x12f   : > { %v436_v7 = vmul.f32 0.7, %v431_v1 }
 0x185   : > { %v321_v44 = vpop.xlane.xlu1 %320 }
 0x186   : > { %603 = vrcp.f32 %v321_v44 }
 0x18c   : > { %v604_v57 = vpop.eup %603 }
 0x18d   : > { %v323_v54 = vpop.xlane.xlu1 %322 }
 0x18e   : > { %605 = vrcp.f32 %v323_v54 }
 0x194   : > { %v606_v3 = vpop.eup %605 }
 0x199   : > { %v382_v58 = vpop.f32.mrf.mxu1 }
 0x19a   : > { %v389_v59 = vmul.f32 %v604_v57, %v382_v58 }
 0x19c   : > { %v433_v62 = vmul.f32 0.3, %v389_v59 }
 0x19e   : > { %v437_v0 = vadd.f32 %v435_v60, %v433_v62 }
 0x1a0   : > { %v439_v2 = vmax.f32 %v437_v0, 0.0 }
 0x1a1   : > { %v384_v4 = vpop.f32.mrf.mxu1 }
 0x1a2   : > { %v441_v5 = vmin.f32 %v439_v2, 1.0  ;;  %v390_v6 = vmul.f32 %v606_v3, %v384_v4 }
 0x1a4   : > { %444 = vst.msk [vmem:[%s248_s6] sm:$0xff] %vm443_vm9, %v441_v5  ;;  %v434_v8 = vmul.f32 0.3, %v390_v6 }
 0x1a6   : > { %v438_v9 = vadd.f32 %v436_v7, %v434_v8 }
 0x1a8   : > { %v440_v10 = vmax.f32 %v438_v9, 0.0 }
 0x1aa   : > { %v442_v11 = vmin.f32 %v440_v10, 1.0 }
 0x1ac   : > { %445 = vst.msk [vmem:[%s248_s6 + $0x8] sm:$0xff] %vm443_vm9, %v442_v11 }
 0x1ad PF: > { %s15_s18 = sadd.s32 1, %s613_s18  }
 0x1ae   : > { %p12_p4 = scmp.ge.s32.totalorder %s15_s18, 4  }
 0x1b0   :  { %14 = sbr.rel (!%p12_p4) target bundleno = 1 (0x1), region = 73 }

</bundles_post_ra>
